<compile_context>
chip_gen: v6e
topology: v6e:2x2x1
jax: 0.10.0
libtpu: 0.0.40
codegen_flags: <defaults>
</compile_context>

<pallas_src>
import functools

import jax
import jax.numpy as jnp
from jax.experimental import pallas as pl
from jax.experimental.pallas import tpu as pltpu


def _conv_lrelu_kernel(x_ref, w_ref, b_ref, o_ref, *,
                       k, stride, oh, ow, wp, l_cols, negative_slope):
    """Fused Conv2d (zero pad) + bias + LeakyReLU for one batch image.

    x_ref: (C, XLEN)    row-flattened, spatially zero-padded input image
    w_ref: (k*k, O, C)  w_ref[dy*k + dx] == weight[:, :, dy, dx]
    b_ref: (O, 1)       bias
    o_ref: (O, OH*OW)   flattened NCHW output for this image
    """
    o_ch = o_ref.shape[0]

    # Implicit GEMM over width-padded output columns j = oy*wp + ox:
    #   acc[:, j] = sum_{dy,dx} W[:, :, dy, dx] @ x_pad[:, oy*s + dy, ox*s + dx]
    acc = jnp.zeros((o_ch, l_cols), jnp.float32)
    for dy in range(k):
        for dx in range(k):
            off = dy * wp + dx
            if stride == 1:
                xs = x_ref[:, off:off + l_cols]              # (C, L), contiguous
            else:
                xs = x_ref[:, pl.ds(off, l_cols, stride)]    # strided load
            acc = acc + jnp.dot(w_ref[dy * k + dx], xs,
                                preferred_element_type=jnp.float32)

    y = acc + b_ref[...]                                     # (O,1) lane-broadcast
    y = jnp.where(y >= 0, y, negative_slope * y).astype(o_ref.dtype)

    # Compact width-padded rows (pitch wp) into dense output rows (pitch ow).
    # The output VMEM block is (O, OH*OW), so the HBM writeback DMA stays dense.
    for oy in range(oh):
        o_ref[:, oy * ow:(oy + 1) * ow] = y[:, oy * wp:oy * wp + ow]


@functools.partial(jax.jit, static_argnames=("stride", "negative_slope"))
def basic_layer_forward(x, weight, bias, *, stride, negative_slope):
    """Equivalent of nn.Conv2d(..., padding=k//2) + LeakyReLU.

    x:      (N, C, H, W)   float32, NCHW
    weight: (O, C, k, k)   float32
    bias:   (O,)           float32
    returns (N, O, OH, OW) float32, NCHW
    """
    n, c, h, w = x.shape
    o_ch, _, k, _ = weight.shape
    p = k // 2
    oh = (h + 2 * p - k) // stride + 1
    ow = (w + 2 * p - k) // stride + 1
    hp, wp = h + 2 * p, w + 2 * p

    # Width-padded output columns the kernel accumulates (valid ones: ox < ow).
    l_cols = (oh - 1) * wp + ow
    # Flat input length touched by the shifted slices (== hp*wp when stride == 1).
    x_len = max(hp * wp, (k - 1) * (wp + 1) + (l_cols - 1) * stride + 1)

    # Spatial zero pad (matches Conv2d padding=k//2), then flatten (H, W) -> HW.
    x_flat = jnp.pad(x, ((0, 0), (0, 0), (p, p), (p, p))).reshape(n, c, hp * wp)
    x_flat = x_flat.astype(jnp.float32)
    if x_len > hp * wp:
        x_flat = jnp.pad(x_flat, ((0, 0), (0, 0), (0, x_len - hp * wp)))

    # Per-tap weight matrices: w_r[dy*k + dx] = weight[:, :, dy, dx]  -> (O, C).
    w_r = weight.transpose(2, 3, 0, 1).reshape(k * k, o_ch, c).astype(jnp.float32)
    b_r = bias.reshape(o_ch, 1).astype(jnp.float32)

    kernel = functools.partial(
        _conv_lrelu_kernel, k=k, stride=stride, oh=oh, ow=ow, wp=wp,
        l_cols=l_cols, negative_slope=negative_slope)

    # VMEM budget: double-buffered input & output blocks + (lane-padded) weights
    # + accumulator, with generous headroom.
    est = 4 * (2 * c * x_len + 2 * o_ch * oh * ow
               + k * k * o_ch * 128 + 128 + 2 * o_ch * l_cols)
    vmem_limit = int(min(64 * 2**20, max(8 * 2**20, 4 * est)))

    out = pl.pallas_call(
        kernel,
        out_shape=jax.ShapeDtypeStruct((n, o_ch, oh * ow), jnp.float32),
        grid_spec=pltpu.PrefetchScalarGridSpec(
            num_scalar_prefetch=0,
            grid=(n,),
            in_specs=[
                pl.BlockSpec((None, c, x_len), lambda i: (i, 0, 0)),     # image
                pl.BlockSpec((k * k, o_ch, c), lambda i: (0, 0, 0)),     # weights
                pl.BlockSpec((o_ch, 1), lambda i: (0, 0)),               # bias
            ],
            out_specs=pl.BlockSpec((None, o_ch, oh * ow), lambda i: (i, 0, 0)),
        ),
        compiler_params=pltpu.CompilerParams(
            dimension_semantics=("parallel",),      # shard batch across TCs (v7x)
            vmem_limit_bytes=vmem_limit,
        ),
    )(x_flat, w_r, b_r)

    # (N, O, OH*OW) -> (N, O, OH, OW): pure metadata reshape, no transpose/copy.
    return out.reshape(n, o_ch, oh, ow)


def _reference(x, weight, bias, *, stride, negative_slope):
    """Pure-JAX reference (matches torch Conv2d + LeakyReLU semantics)."""
    k = weight.shape[-1]
    pad = k // 2
    y = jax.lax.conv_general_dilated(
        x, weight,
        window_strides=(stride, stride),
        padding=((pad, pad), (pad, pad)),
        dimension_numbers=("NCHW", "OIHW", "NCHW"),
    )
    y = y + bias.reshape(1, -1, 1, 1)
    return jnp.where(y >= 0, y, negative_slope * y)


if __name__ == "__main__":
    # Module config (deterministic, synthetic).
    in_chans, out_chans = 4, 8
    kernel_size, stride = 3, 1
    negative_slope = 0.1

    key = jax.random.PRNGKey(0)
    kx, kw, kb = jax.random.split(key, 3)

    x = jax.random.normal(kx, (2, in_chans, 16, 16), dtype=jnp.float32)
    # Deterministic param init (Conv2d shapes: (O, C, k, k) and (O,)).
    fan_in = in_chans * kernel_size * kernel_size
    bound = 1.0 / (fan_in ** 0.5)
    weight = jax.random.uniform(kw, (out_chans, in_chans, kernel_size, kernel_size),
                                minval=-bound, maxval=bound, dtype=jnp.float32)
    bias = jax.random.uniform(kb, (out_chans,), minval=-bound, maxval=bound,
                              dtype=jnp.float32)

    out = basic_layer_forward(x, weight, bias,
                              stride=stride, negative_slope=negative_slope)
    out = jax.block_until_ready(out)

    ref = _reference(x, weight, bias, stride=stride,
                     negative_slope=negative_slope)
    assert out.shape == ref.shape, (out.shape, ref.shape)
    assert jnp.allclose(out, ref, atol=1e-5, rtol=1e-5), "mismatch vs reference"

    print("KERNEL_OK")
</pallas_src>

<mosaic_0001>
module attributes {stable_mosaic.version = 11 : i64} {
  func.func @_conv_lrelu_kernel(%arg0: i32, %arg1: memref<1x4x324xf32, #tpu.memory_space<vmem>>, %arg2: memref<9x8x4xf32, #tpu.memory_space<vmem>>, %arg3: memref<8x1xf32, #tpu.memory_space<vmem>>, %arg4: memref<1x8x256xf32, #tpu.memory_space<vmem>>) attributes {dimension_semantics = [#tpu.dimension_semantics<parallel>], iteration_bounds = array<i64: 2>, scalar_prefetch = 0 : i64, scratch_operands = 0 : i64, tpu.core_type = #tpu.core_type<tc>, window_params = [{transform_indices = @transform_0, window_bounds = array<i64: 1, 4, 324>}, {pipeline_mode = #tpu.pipeline_mode<synchronous>, transform_indices = @transform_1, window_bounds = array<i64: 9, 8, 4>}, {pipeline_mode = #tpu.pipeline_mode<synchronous>, transform_indices = @transform_2, window_bounds = array<i64: 8, 1>}, {transform_indices = @transform_3, window_bounds = array<i64: 1, 8, 256>}]} {
    %cst = arith.constant 0.000000e+00 : f32
    %0 = vector.broadcast %cst : f32 to vector<8x286xf32>
    %c0 = arith.constant 0 : index
    %c0_0 = arith.constant 0 : index
    %c0_1 = arith.constant 0 : index
    %1 = vector.load %arg1[%c0, %c0_0, %c0_1] : memref<1x4x324xf32, #tpu.memory_space<vmem>>, vector<1x4x286xf32>
    %2 = vector.shape_cast %1 : vector<1x4x286xf32> to vector<4x286xf32>
    %c0_2 = arith.constant 0 : index
    %c0_3 = arith.constant 0 : index
    %c0_4 = arith.constant 0 : index
    %3 = vector.load %arg2[%c0_2, %c0_3, %c0_4] : memref<9x8x4xf32, #tpu.memory_space<vmem>>, vector<1x8x4xf32>
    %4 = vector.shape_cast %3 : vector<1x8x4xf32> to vector<8x4xf32>
    %cst_5 = arith.constant dense<0.000000e+00> : vector<8x286xf32>
    %5 = tpu.matmul %4, %2, %cst_5 {dimension_numbers = #tpu.dot_dimension_numbers<[1], [0], [0], [1], [0, 0, 1, 1], [], []>} : vector<8x4xf32>, vector<4x286xf32>, vector<8x286xf32> -> vector<8x286xf32>
    %6 = arith.addf %0, %5 : vector<8x286xf32>
    %c0_6 = arith.constant 0 : index
    %c0_7 = arith.constant 0 : index
    %c1 = arith.constant 1 : index
    %7 = vector.load %arg1[%c0_6, %c0_7, %c1] : memref<1x4x324xf32, #tpu.memory_space<vmem>>, vector<1x4x286xf32>
    %8 = vector.shape_cast %7 : vector<1x4x286xf32> to vector<4x286xf32>
    %c1_8 = arith.constant 1 : index
    %c0_9 = arith.constant 0 : index
    %c0_10 = arith.constant 0 : index
    %9 = vector.load %arg2[%c1_8, %c0_9, %c0_10] : memref<9x8x4xf32, #tpu.memory_space<vmem>>, vector<1x8x4xf32>
    %10 = vector.shape_cast %9 : vector<1x8x4xf32> to vector<8x4xf32>
    %cst_11 = arith.constant dense<0.000000e+00> : vector<8x286xf32>
    %11 = tpu.matmul %10, %8, %cst_11 {dimension_numbers = #tpu.dot_dimension_numbers<[1], [0], [0], [1], [0, 0, 1, 1], [], []>} : vector<8x4xf32>, vector<4x286xf32>, vector<8x286xf32> -> vector<8x286xf32>
    %12 = arith.addf %6, %11 : vector<8x286xf32>
    %c0_12 = arith.constant 0 : index
    %c0_13 = arith.constant 0 : index
    %c2 = arith.constant 2 : index
    %13 = vector.load %arg1[%c0_12, %c0_13, %c2] : memref<1x4x324xf32, #tpu.memory_space<vmem>>, vector<1x4x286xf32>
    %14 = vector.shape_cast %13 : vector<1x4x286xf32> to vector<4x286xf32>
    %c2_14 = arith.constant 2 : index
    %c0_15 = arith.constant 0 : index
    %c0_16 = arith.constant 0 : index
    %15 = vector.load %arg2[%c2_14, %c0_15, %c0_16] : memref<9x8x4xf32, #tpu.memory_space<vmem>>, vector<1x8x4xf32>
    %16 = vector.shape_cast %15 : vector<1x8x4xf32> to vector<8x4xf32>
    %cst_17 = arith.constant dense<0.000000e+00> : vector<8x286xf32>
    %17 = tpu.matmul %16, %14, %cst_17 {dimension_numbers = #tpu.dot_dimension_numbers<[1], [0], [0], [1], [0, 0, 1, 1], [], []>} : vector<8x4xf32>, vector<4x286xf32>, vector<8x286xf32> -> vector<8x286xf32>
    %18 = arith.addf %12, %17 : vector<8x286xf32>
    %c0_18 = arith.constant 0 : index
    %c0_19 = arith.constant 0 : index
    %c18 = arith.constant 18 : index
    %19 = vector.load %arg1[%c0_18, %c0_19, %c18] : memref<1x4x324xf32, #tpu.memory_space<vmem>>, vector<1x4x286xf32>
    %20 = vector.shape_cast %19 : vector<1x4x286xf32> to vector<4x286xf32>
    %c3 = arith.constant 3 : index
    %c0_20 = arith.constant 0 : index
    %c0_21 = arith.constant 0 : index
    %21 = vector.load %arg2[%c3, %c0_20, %c0_21] : memref<9x8x4xf32, #tpu.memory_space<vmem>>, vector<1x8x4xf32>
    %22 = vector.shape_cast %21 : vector<1x8x4xf32> to vector<8x4xf32>
    %cst_22 = arith.constant dense<0.000000e+00> : vector<8x286xf32>
    %23 = tpu.matmul %22, %20, %cst_22 {dimension_numbers = #tpu.dot_dimension_numbers<[1], [0], [0], [1], [0, 0, 1, 1], [], []>} : vector<8x4xf32>, vector<4x286xf32>, vector<8x286xf32> -> vector<8x286xf32>
    %24 = arith.addf %18, %23 : vector<8x286xf32>
    %c0_23 = arith.constant 0 : index
    %c0_24 = arith.constant 0 : index
    %c19 = arith.constant 19 : index
    %25 = vector.load %arg1[%c0_23, %c0_24, %c19] : memref<1x4x324xf32, #tpu.memory_space<vmem>>, vector<1x4x286xf32>
    %26 = vector.shape_cast %25 : vector<1x4x286xf32> to vector<4x286xf32>
    %c4 = arith.constant 4 : index
    %c0_25 = arith.constant 0 : index
    %c0_26 = arith.constant 0 : index
    %27 = vector.load %arg2[%c4, %c0_25, %c0_26] : memref<9x8x4xf32, #tpu.memory_space<vmem>>, vector<1x8x4xf32>
    %28 = vector.shape_cast %27 : vector<1x8x4xf32> to vector<8x4xf32>
    %cst_27 = arith.constant dense<0.000000e+00> : vector<8x286xf32>
    %29 = tpu.matmul %28, %26, %cst_27 {dimension_numbers = #tpu.dot_dimension_numbers<[1], [0], [0], [1], [0, 0, 1, 1], [], []>} : vector<8x4xf32>, vector<4x286xf32>, vector<8x286xf32> -> vector<8x286xf32>
    %30 = arith.addf %24, %29 : vector<8x286xf32>
    %c0_28 = arith.constant 0 : index
    %c0_29 = arith.constant 0 : index
    %c20 = arith.constant 20 : index
    %31 = vector.load %arg1[%c0_28, %c0_29, %c20] : memref<1x4x324xf32, #tpu.memory_space<vmem>>, vector<1x4x286xf32>
    %32 = vector.shape_cast %31 : vector<1x4x286xf32> to vector<4x286xf32>
    %c5 = arith.constant 5 : index
    %c0_30 = arith.constant 0 : index
    %c0_31 = arith.constant 0 : index
    %33 = vector.load %arg2[%c5, %c0_30, %c0_31] : memref<9x8x4xf32, #tpu.memory_space<vmem>>, vector<1x8x4xf32>
    %34 = vector.shape_cast %33 : vector<1x8x4xf32> to vector<8x4xf32>
    %cst_32 = arith.constant dense<0.000000e+00> : vector<8x286xf32>
    %35 = tpu.matmul %34, %32, %cst_32 {dimension_numbers = #tpu.dot_dimension_numbers<[1], [0], [0], [1], [0, 0, 1, 1], [], []>} : vector<8x4xf32>, vector<4x286xf32>, vector<8x286xf32> -> vector<8x286xf32>
    %36 = arith.addf %30, %35 : vector<8x286xf32>
    %c0_33 = arith.constant 0 : index
    %c0_34 = arith.constant 0 : index
    %c36 = arith.constant 36 : index
    %37 = vector.load %arg1[%c0_33, %c0_34, %c36] : memref<1x4x324xf32, #tpu.memory_space<vmem>>, vector<1x4x286xf32>
    %38 = vector.shape_cast %37 : vector<1x4x286xf32> to vector<4x286xf32>
    %c6 = arith.constant 6 : index
    %c0_35 = arith.constant 0 : index
    %c0_36 = arith.constant 0 : index
    %39 = vector.load %arg2[%c6, %c0_35, %c0_36] : memref<9x8x4xf32, #tpu.memory_space<vmem>>, vector<1x8x4xf32>
    %40 = vector.shape_cast %39 : vector<1x8x4xf32> to vector<8x4xf32>
    %cst_37 = arith.constant dense<0.000000e+00> : vector<8x286xf32>
    %41 = tpu.matmul %40, %38, %cst_37 {dimension_numbers = #tpu.dot_dimension_numbers<[1], [0], [0], [1], [0, 0, 1, 1], [], []>} : vector<8x4xf32>, vector<4x286xf32>, vector<8x286xf32> -> vector<8x286xf32>
    %42 = arith.addf %36, %41 : vector<8x286xf32>
    %c0_38 = arith.constant 0 : index
    %c0_39 = arith.constant 0 : index
    %c37 = arith.constant 37 : index
    %43 = vector.load %arg1[%c0_38, %c0_39, %c37] : memref<1x4x324xf32, #tpu.memory_space<vmem>>, vector<1x4x286xf32>
    %44 = vector.shape_cast %43 : vector<1x4x286xf32> to vector<4x286xf32>
    %c7 = arith.constant 7 : index
    %c0_40 = arith.constant 0 : index
    %c0_41 = arith.constant 0 : index
    %45 = vector.load %arg2[%c7, %c0_40, %c0_41] : memref<9x8x4xf32, #tpu.memory_space<vmem>>, vector<1x8x4xf32>
    %46 = vector.shape_cast %45 : vector<1x8x4xf32> to vector<8x4xf32>
    %cst_42 = arith.constant dense<0.000000e+00> : vector<8x286xf32>
    %47 = tpu.matmul %46, %44, %cst_42 {dimension_numbers = #tpu.dot_dimension_numbers<[1], [0], [0], [1], [0, 0, 1, 1], [], []>} : vector<8x4xf32>, vector<4x286xf32>, vector<8x286xf32> -> vector<8x286xf32>
    %48 = arith.addf %42, %47 : vector<8x286xf32>
    %c0_43 = arith.constant 0 : index
    %c0_44 = arith.constant 0 : index
    %c38 = arith.constant 38 : index
    %49 = vector.load %arg1[%c0_43, %c0_44, %c38] : memref<1x4x324xf32, #tpu.memory_space<vmem>>, vector<1x4x286xf32>
    %50 = vector.shape_cast %49 : vector<1x4x286xf32> to vector<4x286xf32>
    %c8 = arith.constant 8 : index
    %c0_45 = arith.constant 0 : index
    %c0_46 = arith.constant 0 : index
    %51 = vector.load %arg2[%c8, %c0_45, %c0_46] : memref<9x8x4xf32, #tpu.memory_space<vmem>>, vector<1x8x4xf32>
    %52 = vector.shape_cast %51 : vector<1x8x4xf32> to vector<8x4xf32>
    %cst_47 = arith.constant dense<0.000000e+00> : vector<8x286xf32>
    %53 = tpu.matmul %52, %50, %cst_47 {dimension_numbers = #tpu.dot_dimension_numbers<[1], [0], [0], [1], [0, 0, 1, 1], [], []>} : vector<8x4xf32>, vector<4x286xf32>, vector<8x286xf32> -> vector<8x286xf32>
    %54 = arith.addf %48, %53 : vector<8x286xf32>
    %c0_48 = arith.constant 0 : index
    %c0_49 = arith.constant 0 : index
    %55 = vector.load %arg3[%c0_48, %c0_49] : memref<8x1xf32, #tpu.memory_space<vmem>>, vector<8x1xf32>
    %56 = vector.broadcast %55 : vector<8x1xf32> to vector<8x286xf32>
    %57 = arith.addf %54, %56 : vector<8x286xf32>
    %cst_50 = arith.constant 0.000000e+00 : f32
    %58 = vector.broadcast %cst_50 : f32 to vector<8x286xf32>
    %59 = arith.cmpf oge, %57, %58 : vector<8x286xf32>
    %cst_51 = arith.constant 1.000000e-01 : f32
    %60 = vector.broadcast %cst_51 : f32 to vector<8x286xf32>
    %61 = arith.mulf %60, %57 : vector<8x286xf32>
    %62 = arith.select %59, %57, %61 : vector<8x286xi1>, vector<8x286xf32>
    %63 = vector.extract_strided_slice %62 {offsets = [0, 0], sizes = [8, 16], strides = [1, 1]} : vector<8x286xf32> to vector<8x16xf32>
    %c0_52 = arith.constant 0 : index
    %c0_53 = arith.constant 0 : index
    %c0_54 = arith.constant 0 : index
    %64 = vector.load %arg4[%c0_52, %c0_53, %c0_54] : memref<1x8x256xf32, #tpu.memory_space<vmem>>, vector<1x8x16xf32>
    %65 = vector.shape_cast %64 : vector<1x8x16xf32> to vector<8x16xf32>
    %66 = vector.shape_cast %63 : vector<8x16xf32> to vector<1x8x16xf32>
    tpu.vector_store %arg4[%c0_52, %c0_53, %c0_54], %66 {strides = array<i32>} : memref<1x8x256xf32, #tpu.memory_space<vmem>>, vector<1x8x16xf32>,
    %67 = vector.extract_strided_slice %62 {offsets = [0, 18], sizes = [8, 16], strides = [1, 1]} : vector<8x286xf32> to vector<8x16xf32>
    %c0_55 = arith.constant 0 : index
    %c0_56 = arith.constant 0 : index
    %c16 = arith.constant 16 : index
    %68 = vector.load %arg4[%c0_55, %c0_56, %c16] : memref<1x8x256xf32, #tpu.memory_space<vmem>>, vector<1x8x16xf32>
    %69 = vector.shape_cast %68 : vector<1x8x16xf32> to vector<8x16xf32>
    %70 = vector.shape_cast %67 : vector<8x16xf32> to vector<1x8x16xf32>
    tpu.vector_store %arg4[%c0_55, %c0_56, %c16], %70 {strides = array<i32>} : memref<1x8x256xf32, #tpu.memory_space<vmem>>, vector<1x8x16xf32>,
    %71 = vector.extract_strided_slice %62 {offsets = [0, 36], sizes = [8, 16], strides = [1, 1]} : vector<8x286xf32> to vector<8x16xf32>
    %c0_57 = arith.constant 0 : index
    %c0_58 = arith.constant 0 : index
    %c32 = arith.constant 32 : index
    %72 = vector.load %arg4[%c0_57, %c0_58, %c32] : memref<1x8x256xf32, #tpu.memory_space<vmem>>, vector<1x8x16xf32>
    %73 = vector.shape_cast %72 : vector<1x8x16xf32> to vector<8x16xf32>
    %74 = vector.shape_cast %71 : vector<8x16xf32> to vector<1x8x16xf32>
    tpu.vector_store %arg4[%c0_57, %c0_58, %c32], %74 {strides = array<i32>} : memref<1x8x256xf32, #tpu.memory_space<vmem>>, vector<1x8x16xf32>,
    %75 = vector.extract_strided_slice %62 {offsets = [0, 54], sizes = [8, 16], strides = [1, 1]} : vector<8x286xf32> to vector<8x16xf32>
    %c0_59 = arith.constant 0 : index
    %c0_60 = arith.constant 0 : index
    %c48 = arith.constant 48 : index
    %76 = vector.load %arg4[%c0_59, %c0_60, %c48] : memref<1x8x256xf32, #tpu.memory_space<vmem>>, vector<1x8x16xf32>
    %77 = vector.shape_cast %76 : vector<1x8x16xf32> to vector<8x16xf32>
    %78 = vector.shape_cast %75 : vector<8x16xf32> to vector<1x8x16xf32>
    tpu.vector_store %arg4[%c0_59, %c0_60, %c48], %78 {strides = array<i32>} : memref<1x8x256xf32, #tpu.memory_space<vmem>>, vector<1x8x16xf32>,
    %79 = vector.extract_strided_slice %62 {offsets = [0, 72], sizes = [8, 16], strides = [1, 1]} : vector<8x286xf32> to vector<8x16xf32>
    %c0_61 = arith.constant 0 : index
    %c0_62 = arith.constant 0 : index
    %c64 = arith.constant 64 : index
    %80 = vector.load %arg4[%c0_61, %c0_62, %c64] : memref<1x8x256xf32, #tpu.memory_space<vmem>>, vector<1x8x16xf32>
    %81 = vector.shape_cast %80 : vector<1x8x16xf32> to vector<8x16xf32>
    %82 = vector.shape_cast %79 : vector<8x16xf32> to vector<1x8x16xf32>
    tpu.vector_store %arg4[%c0_61, %c0_62, %c64], %82 {strides = array<i32>} : memref<1x8x256xf32, #tpu.memory_space<vmem>>, vector<1x8x16xf32>,
    %83 = vector.extract_strided_slice %62 {offsets = [0, 90], sizes = [8, 16], strides = [1, 1]} : vector<8x286xf32> to vector<8x16xf32>
    %c0_63 = arith.constant 0 : index
    %c0_64 = arith.constant 0 : index
    %c80 = arith.constant 80 : index
    %84 = vector.load %arg4[%c0_63, %c0_64, %c80] : memref<1x8x256xf32, #tpu.memory_space<vmem>>, vector<1x8x16xf32>
    %85 = vector.shape_cast %84 : vector<1x8x16xf32> to vector<8x16xf32>
    %86 = vector.shape_cast %83 : vector<8x16xf32> to vector<1x8x16xf32>
    tpu.vector_store %arg4[%c0_63, %c0_64, %c80], %86 {strides = array<i32>} : memref<1x8x256xf32, #tpu.memory_space<vmem>>, vector<1x8x16xf32>,
    %87 = vector.extract_strided_slice %62 {offsets = [0, 108], sizes = [8, 16], strides = [1, 1]} : vector<8x286xf32> to vector<8x16xf32>
    %c0_65 = arith.constant 0 : index
    %c0_66 = arith.constant 0 : index
    %c96 = arith.constant 96 : index
    %88 = vector.load %arg4[%c0_65, %c0_66, %c96] : memref<1x8x256xf32, #tpu.memory_space<vmem>>, vector<1x8x16xf32>
    %89 = vector.shape_cast %88 : vector<1x8x16xf32> to vector<8x16xf32>
    %90 = vector.shape_cast %87 : vector<8x16xf32> to vector<1x8x16xf32>
    tpu.vector_store %arg4[%c0_65, %c0_66, %c96], %90 {strides = array<i32>} : memref<1x8x256xf32, #tpu.memory_space<vmem>>, vector<1x8x16xf32>,
    %91 = vector.extract_strided_slice %62 {offsets = [0, 126], sizes = [8, 16], strides = [1, 1]} : vector<8x286xf32> to vector<8x16xf32>
    %c0_67 = arith.constant 0 : index
    %c0_68 = arith.constant 0 : index
    %c112 = arith.constant 112 : index
    %92 = vector.load %arg4[%c0_67, %c0_68, %c112] : memref<1x8x256xf32, #tpu.memory_space<vmem>>, vector<1x8x16xf32>
    %93 = vector.shape_cast %92 : vector<1x8x16xf32> to vector<8x16xf32>
    %94 = vector.shape_cast %91 : vector<8x16xf32> to vector<1x8x16xf32>
    tpu.vector_store %arg4[%c0_67, %c0_68, %c112], %94 {strides = array<i32>} : memref<1x8x256xf32, #tpu.memory_space<vmem>>, vector<1x8x16xf32>,
    %95 = vector.extract_strided_slice %62 {offsets = [0, 144], sizes = [8, 16], strides = [1, 1]} : vector<8x286xf32> to vector<8x16xf32>
    %c0_69 = arith.constant 0 : index
    %c0_70 = arith.constant 0 : index
    %c128 = arith.constant 128 : index
    %96 = vector.load %arg4[%c0_69, %c0_70, %c128] : memref<1x8x256xf32, #tpu.memory_space<vmem>>, vector<1x8x16xf32>
    %97 = vector.shape_cast %96 : vector<1x8x16xf32> to vector<8x16xf32>
    %98 = vector.shape_cast %95 : vector<8x16xf32> to vector<1x8x16xf32>
    tpu.vector_store %arg4[%c0_69, %c0_70, %c128], %98 {strides = array<i32>} : memref<1x8x256xf32, #tpu.memory_space<vmem>>, vector<1x8x16xf32>,
    %99 = vector.extract_strided_slice %62 {offsets = [0, 162], sizes = [8, 16], strides = [1, 1]} : vector<8x286xf32> to vector<8x16xf32>
    %c0_71 = arith.constant 0 : index
    %c0_72 = arith.constant 0 : index
    %c144 = arith.constant 144 : index
    %100 = vector.load %arg4[%c0_71, %c0_72, %c144] : memref<1x8x256xf32, #tpu.memory_space<vmem>>, vector<1x8x16xf32>
    %101 = vector.shape_cast %100 : vector<1x8x16xf32> to vector<8x16xf32>
    %102 = vector.shape_cast %99 : vector<8x16xf32> to vector<1x8x16xf32>
    tpu.vector_store %arg4[%c0_71, %c0_72, %c144], %102 {strides = array<i32>} : memref<1x8x256xf32, #tpu.memory_space<vmem>>, vector<1x8x16xf32>,
    %103 = vector.extract_strided_slice %62 {offsets = [0, 180], sizes = [8, 16], strides = [1, 1]} : vector<8x286xf32> to vector<8x16xf32>
    %c0_73 = arith.constant 0 : index
    %c0_74 = arith.constant 0 : index
    %c160 = arith.constant 160 : index
    %104 = vector.load %arg4[%c0_73, %c0_74, %c160] : memref<1x8x256xf32, #tpu.memory_space<vmem>>, vector<1x8x16xf32>
    %105 = vector.shape_cast %104 : vector<1x8x16xf32> to vector<8x16xf32>
    %106 = vector.shape_cast %103 : vector<8x16xf32> to vector<1x8x16xf32>
    tpu.vector_store %arg4[%c0_73, %c0_74, %c160], %106 {strides = array<i32>} : memref<1x8x256xf32, #tpu.memory_space<vmem>>, vector<1x8x16xf32>,
    %107 = vector.extract_strided_slice %62 {offsets = [0, 198], sizes = [8, 16], strides = [1, 1]} : vector<8x286xf32> to vector<8x16xf32>
    %c0_75 = arith.constant 0 : index
    %c0_76 = arith.constant 0 : index
    %c176 = arith.constant 176 : index
    %108 = vector.load %arg4[%c0_75, %c0_76, %c176] : memref<1x8x256xf32, #tpu.memory_space<vmem>>, vector<1x8x16xf32>
    %109 = vector.shape_cast %108 : vector<1x8x16xf32> to vector<8x16xf32>
    %110 = vector.shape_cast %107 : vector<8x16xf32> to vector<1x8x16xf32>
    tpu.vector_store %arg4[%c0_75, %c0_76, %c176], %110 {strides = array<i32>} : memref<1x8x256xf32, #tpu.memory_space<vmem>>, vector<1x8x16xf32>,
    %111 = vector.extract_strided_slice %62 {offsets = [0, 216], sizes = [8, 16], strides = [1, 1]} : vector<8x286xf32> to vector<8x16xf32>
    %c0_77 = arith.constant 0 : index
    %c0_78 = arith.constant 0 : index
    %c192 = arith.constant 192 : index
    %112 = vector.load %arg4[%c0_77, %c0_78, %c192] : memref<1x8x256xf32, #tpu.memory_space<vmem>>, vector<1x8x16xf32>
    %113 = vector.shape_cast %112 : vector<1x8x16xf32> to vector<8x16xf32>
    %114 = vector.shape_cast %111 : vector<8x16xf32> to vector<1x8x16xf32>
    tpu.vector_store %arg4[%c0_77, %c0_78, %c192], %114 {strides = array<i32>} : memref<1x8x256xf32, #tpu.memory_space<vmem>>, vector<1x8x16xf32>,
    %115 = vector.extract_strided_slice %62 {offsets = [0, 234], sizes = [8, 16], strides = [1, 1]} : vector<8x286xf32> to vector<8x16xf32>
    %c0_79 = arith.constant 0 : index
    %c0_80 = arith.constant 0 : index
    %c208 = arith.constant 208 : index
    %116 = vector.load %arg4[%c0_79, %c0_80, %c208] : memref<1x8x256xf32, #tpu.memory_space<vmem>>, vector<1x8x16xf32>
    %117 = vector.shape_cast %116 : vector<1x8x16xf32> to vector<8x16xf32>
    %118 = vector.shape_cast %115 : vector<8x16xf32> to vector<1x8x16xf32>
    tpu.vector_store %arg4[%c0_79, %c0_80, %c208], %118 {strides = array<i32>} : memref<1x8x256xf32, #tpu.memory_space<vmem>>, vector<1x8x16xf32>,
    %119 = vector.extract_strided_slice %62 {offsets = [0, 252], sizes = [8, 16], strides = [1, 1]} : vector<8x286xf32> to vector<8x16xf32>
    %c0_81 = arith.constant 0 : index
    %c0_82 = arith.constant 0 : index
    %c224 = arith.constant 224 : index
    %120 = vector.load %arg4[%c0_81, %c0_82, %c224] : memref<1x8x256xf32, #tpu.memory_space<vmem>>, vector<1x8x16xf32>
    %121 = vector.shape_cast %120 : vector<1x8x16xf32> to vector<8x16xf32>
    %122 = vector.shape_cast %119 : vector<8x16xf32> to vector<1x8x16xf32>
    tpu.vector_store %arg4[%c0_81, %c0_82, %c224], %122 {strides = array<i32>} : memref<1x8x256xf32, #tpu.memory_space<vmem>>, vector<1x8x16xf32>,
    %123 = vector.extract_strided_slice %62 {offsets = [0, 270], sizes = [8, 16], strides = [1, 1]} : vector<8x286xf32> to vector<8x16xf32>
    %c0_83 = arith.constant 0 : index
    %c0_84 = arith.constant 0 : index
    %c240 = arith.constant 240 : index
    %124 = vector.load %arg4[%c0_83, %c0_84, %c240] : memref<1x8x256xf32, #tpu.memory_space<vmem>>, vector<1x8x16xf32>
    %125 = vector.shape_cast %124 : vector<1x8x16xf32> to vector<8x16xf32>
    %126 = vector.shape_cast %123 : vector<8x16xf32> to vector<1x8x16xf32>
    tpu.vector_store %arg4[%c0_83, %c0_84, %c240], %126 {strides = array<i32>} : memref<1x8x256xf32, #tpu.memory_space<vmem>>, vector<1x8x16xf32>,
    return
  }
  func.func @transform_0(%arg0: i32) -> (i32, i32, i32) {
    %c0_i32 = arith.constant 0 : i32
    %c0_i32_0 = arith.constant 0 : i32
    %c0_i32_1 = arith.constant 0 : i32
    return %arg0, %c0_i32, %c0_i32_0 : i32, i32, i32
  }
  func.func @transform_1(%arg0: i32) -> (i32, i32, i32) {
    %c0_i32 = arith.constant 0 : i32
    %c0_i32_0 = arith.constant 0 : i32
    %c0_i32_1 = arith.constant 0 : i32
    %c0_i32_2 = arith.constant 0 : i32
    return %c0_i32, %c0_i32_0, %c0_i32_1 : i32, i32, i32
  }
  func.func @transform_2(%arg0: i32) -> (i32, i32) {
    %c0_i32 = arith.constant 0 : i32
    %c0_i32_0 = arith.constant 0 : i32
    %c0_i32_1 = arith.constant 0 : i32
    return %c0_i32, %c0_i32_0 : i32, i32
  }
  func.func @transform_3(%arg0: i32) -> (i32, i32, i32) {
    %c0_i32 = arith.constant 0 : i32
    %c0_i32_0 = arith.constant 0 : i32
    %c0_i32_1 = arith.constant 0 : i32
    return %arg0, %c0_i32, %c0_i32_0 : i32, i32, i32
  }
}

</mosaic_0001>

<bundles_post_ra>
// kernel: basic_layer_forward.1
= control target key start
LH: loop header
LB: loop body
LE: loop exit
PB: predicated region body
PF: predicated region fallthrough
CT: control target
= control target key end

     0   :  { %s2038_s12 = smov 0   ;;  %s2257_s0 = inlined_call_operand.vmem [shape: f32[2,4,324], index: 0, kind: input, shape index: {}]   ;;  %s2258_s1 = inlined_call_operand.vmem [shape: f32[9,8,4], index: 1, kind: input, shape index: {}]   ;;  %s2259_s2 = inlined_call_operand.vmem [shape: f32[8,1], index: 2, kind: input, shape index: {}]   ;;  %s2260_s3 = inlined_call_operand.vmem [shape: f32[2,8,256], index: 3, kind: output, shape index: {}]  }
   0x1 LB: > { %s1826_s13 = sadd.s32 4294967295, %s1993_s12   ;;  %p1830_p0 = scmp.ge.s32.totalorder %s1993_s12, 1  ;;  %s1993_s12 = sphi %s2038_s12, %s13_s12  }
   0x2   : > { %p137_p1 = scmp.lt.s32.totalorder %s1993_s12, 3 }
   0x4   : > { %p138_p2 = pnand %p1830_p0, %p137_p1 }
   0x5   : > { %p161_p3 = scmp.lt.s32.totalorder (!%p138_p2), %s1826_s13, 1  ;;  %s1997_s18 = smov (!%p138_p2), 127  }
   0x6   : > { %141 = sbr.rel (%p138_p2) target bundleno = 527 (0x20f), region = 32  ;;  %s1998_s19 = smov (!%p138_p2), 126  }
   0x7   : > { %s1999_s20 = smov (!%p138_p2), 110   ;;  %s2000_s21 = smov (!%p138_p2), 109  }
   0x8   : > { %s2001_s22 = smov (!%p138_p2), 108   ;;  %s2002_s23 = smov (!%p138_p2), 92  }
   0x9   : > { %s2004_s24 = smov (!%p138_p2), 91   ;;  %s2005_s25 = smov (!%p138_p2), 90  }
   0xa   : > { %s2006_s28 = smov (!%p138_p2), 100   ;;  %s2008_s29 = smov (!%p138_p2), 124  }
   0xb   : > { %v1995_v0 = vmov 0.0   ;;  %vm1996_vm0 = vmmov 0   ;;  %s2262_s13 = smov (!%p161_p3, %s1826_s13), 1  ;;  %v2003_v10 = vmov 0   ;;  %v1673_v12 = vld [vmem:[%s2259_s2] sm:$0xff]  ;;  %vm192_vm1 = vcmask 1043456  }
   0xc   : > { %1908 = vmatprep.subr.mxu1 %v1995_v0  ;;  %1910 = vmatprep.mubr.msk.f32.mxu1 %vm1996_vm0, %v1995_v0  ;;  %s1953_s14 = smul.u32 12, %s2262_s13  ;;  %v1834_v13 = vld [vmem:[%s2258_s1 + $0x8] sm:$0xff]  ;;  %vm188_vm2 = vcmask 31744   ;;  %v173_v16 = vld [vmem:[%s2258_s1] sm:$0xff]  ;;  %vm185_vm3 = vcmask 1039360   ;;  %v1845_v19 = vld [vmem:[%s2258_s1 + $0x10] sm:$0xff] }
   0xd   : > { %263 = vmatprep.mubr.f32.mxu0 %v1995_v0  ;;  %1985 = vset.pattern.permute.xlu0 %v2003_v10  ;;  %vm503_vm4 = vcmask 1031168   ;;  %v1851_v26 = vld [vmem:[%s2258_s1 + $0x18] sm:$0xff]  ;;  %vm672_vm5 = vcmask 900096   ;;  %vm841_vm6 = vcmask 891904   ;;  %v1857_v35 = vld [vmem:[%s2258_s1 + $0x20] sm:$0xff]  ;;  %vm1010_vm7 = vcmask 883712  }
   0xe   : > { %s2056_s17 = scalar_lea.vmem %s2257_s0, %s1953_s14  ;;  %v1863_v40 = vld [vmem:[%s2258_s1 + $0x28] sm:$0xff]  ;;  %vm1179_vm8 = vcmask 752640   ;;  %v1869_v45 = vld [vmem:[%s2258_s1 + $0x30] sm:$0xff]  ;;  %vm1348_vm9 = vcmask 744448   ;;  %v1875_v50 = vld [vmem:[%s2258_s1 + $0x38] sm:$0xff]  ;;  %vm1517_vm10 = vcmask 736256  }
   0xf   : > { %v172_v1 = vld [vmem:[%s2056_s17 + $0x8] sm:$0xf]  ;;  %v2060_v2 = vld [vmem:[%s2056_s17] sm:$0xff]  ;;  %vm1691_vm12 = vcmask 130048   ;;  %s2009_s30 = smov 122   ;;  %s2010_s4 = smov 120  }
  0x10   : > { %183 = vrot.lane.b32.xlu0 %v172_v1, %s1997_s18  ;;  %179 = vrot.lane.b32.xlu1 %v2060_v2, %s1997_s18  ;;  %v491_v3 = vld [vmem:[%s2056_s17 + $0x8] sm:$0xf]  ;;  %v2067_v4 = vcombine.high %v2060_v2, %v2060_v2  ;;  %v1881_v57 = vld [vmem:[%s2258_s1 + $0x40] sm:$0xff]  ;;  %s2011_s5 = smov 106   ;;  %s2013_s6 = smov 104   ;;  %vm1697_vm15 = vcmask 261248  }
  0x11   : > { %v660_v5 = vld [vmem:[%s2056_s17 + $0x8] sm:$0xf]  ;;  %s2014_s7 = smov 116   ;;  %s2015_s8 = smov 102  }
  0x12   : > { %v829_v6 = vld [vmem:[%s2056_s17 + $0x8] sm:$0xf]  ;;  %s2016_s9 = smov 112  }
  0x13   : > { %v998_v7 = vld [vmem:[%s2056_s17 + $0x8] sm:$0xf] }
  0x14   : > { %501 = vrot.lane.b32.xlu0 %v491_v3, %s1998_s19  ;;  %497 = vrot.lane.b32.xlu1 %v2060_v2, %s1998_s19  ;;  %v1167_v8 = vld [vmem:[%s2056_s17 + $0x8] sm:$0xf] }
  0x15   : > { %v1336_v9 = vld [vmem:[%s2056_s17 + $0x8] sm:$0xf] }
  0x16   : > { %v1505_v11 = vld [vmem:[%s2056_s17 + $0x8] sm:$0xf] }
  0x18   : > { %499 = vrot.lane.b32.xlu1 %v2067_v4, %s1998_s19  ;;  %181 = vrot.lane.b32.xlu0 %v2067_v4, %s1997_s18 }
  0x1c   : > { %670 = vrot.lane.b32.xlu1 %v660_v5, %s1999_s20  ;;  %668 = vrot.lane.b32.xlu0 %v2067_v4, %s1999_s20 }
  0x20   : > { %837 = vrot.lane.b32.xlu1 %v2067_v4, %s2000_s21  ;;  %666 = vrot.lane.b32.xlu0 %v2060_v2, %s1999_s20 }
  0x24   : > { %835 = vrot.lane.b32.xlu1 %v2060_v2, %s2000_s21  ;;  %839 = vrot.lane.b32.xlu0 %v829_v6, %s2000_s21 }
  0x28   : > { %1008 = vrot.lane.b32.xlu1 %v998_v7, %s2001_s22  ;;  %1006 = vrot.lane.b32.xlu0 %v2067_v4, %s2001_s22 }
  0x2c   : > { %1175 = vrot.lane.b32.xlu1 %v2067_v4, %s2002_s23  ;;  %1004 = vrot.lane.b32.xlu0 %v2060_v2, %s2001_s22 }
  0x30   : > { %1173 = vrot.lane.b32.xlu1 %v2060_v2, %s2002_s23  ;;  %1177 = vrot.lane.b32.xlu0 %v1167_v8, %s2002_s23 }
  0x34   : > { %1346 = vrot.lane.b32.xlu1 %v1336_v9, %s2004_s24  ;;  %1344 = vrot.lane.b32.xlu0 %v2067_v4, %s2004_s24 }
  0x38   : > { %1513 = vrot.lane.b32.xlu1 %v2067_v4, %s2005_s25  ;;  %1342 = vrot.lane.b32.xlu0 %v2060_v2, %s2004_s24  ;;  %s1889_s24 = sshll.u32 %s2262_s13, 4  ;;  %s2007_s13 = smov 114  }
  0x39   : > { %s2217_s27 = scalar_lea.vmem %s2260_s3, %s1889_s24 }
  0x3c   : > { %1511 = vrot.lane.b32.xlu1 %v2060_v2, %s2005_s25  ;;  %1515 = vrot.lane.b32.xlu0 %v1505_v11, %s2005_s25 }
  0x40   : > { %1676 = vperm.xlu0 %1985, %v1673_v12  }
  0x82   : > { %v184_v14 = vpop.permute.xlu0 %183  ;;  %v180_v15 = vpop.permute.xlu1 %179 }
  0x83   : > { %1909 = vmatpush3.msk.msra.mxu1 %vm192_vm1, %v184_v14 }
  0x84   : > { %1911 = vmatmul.mubr.msk.f32.vlgmr.msra.gmra.mxu1 %vm188_vm2, %v1834_v13  ;;  %1913 = vmatprep.subr.mxu1 %v1995_v0 }
  0x85   : > { %1914 = vmatpush3.msk.msra.mxu1 %vm192_vm1, %v172_v1  ;;  %1915 = vmatprep.mubr.msk.f32.mxu1 %vm1996_vm0, %v1995_v0 }
  0x86   : > { %v502_v17 = vpop.permute.xlu0 %501  ;;  %v498_v18 = vpop.permute.xlu1 %497  ;;  %1918 = vmatprep.subr.mxu1 %v1995_v0 }
  0x88   : > { %1916 = vmatmul.mubr.msk.f32.vlgmr.msra.gmra.mxu1 %vm188_vm2, %v173_v16 }
  0x89   : > { %1919 = vmatpush3.msk.msra.mxu1 %vm192_vm1, %v502_v17  ;;  %1920 = vmatprep.mubr.msk.f32.mxu1 %vm1996_vm0, %v1995_v0 }
  0x8a   : > { %v500_v20 = vpop.permute.xlu1 %499  ;;  %v182_v21 = vpop.permute.xlu0 %181  ;;  %1923 = vmatprep.subr.mxu1 %v1995_v0 }
  0x8b   : > { %v187_v22 = vsel %vm185_vm3, %v182_v21, %v184_v14  ;;  %v186_v23 = vsel %vm185_vm3, %v180_v15, %v182_v21  ;;  %v505_v27 = vsel %vm503_vm4, %v500_v20, %v502_v17  ;;  %v504_v28 = vsel %vm503_vm4, %v498_v18, %v500_v20 }
  0x8c   : > { %1835 = vmatprep.subr.msk.mxu0 %vm192_vm1, %v187_v22  ;;  %1921 = vmatmul.mubr.msk.f32.vlgmr.msra.gmra.mxu1 %vm188_vm2, %v1845_v19  ;;  %vm1717_vm3 = vcmask 786048   ;;  %vm1722_vm4 = vcmask 917248  }
  0x8d   : > { %1836 = vmatpush1.msk.msra.mxu0 %vm192_vm1, %v186_v23  ;;  %1925 = vmatprep.mubr.msk.f32.mxu1 %vm1996_vm0, %v1995_v0 }
  0x8e   : > { %v671_v24 = vpop.permute.xlu1 %670  ;;  %1837 = vmatmul.mubr.msk.f32.vlgmr.msra.gmra.mxu0 %vm188_vm2, %v1834_v13  ;;  %1840 = vmatprep.subr.msk.mxu0 %vm192_vm1, %v2067_v4  ;;  %v669_v25 = vpop.permute.xlu0 %668 }
  0x8f   : > { %1841 = vmatpush1.msk.msra.mxu0 %vm192_vm1, %v2060_v2  ;;  %1924 = vmatpush3.msk.msra.mxu1 %vm192_vm1, %v671_v24  ;;  %v674_v31 = vsel %vm672_vm5, %v669_v25, %v671_v24 }
  0x90   : > { %1846 = vmatprep.subr.msk.mxu0 %vm192_vm1, %v505_v27  ;;  %413 = vmatprep.mubr.f32.mxu0 %v1995_v0 }
  0x91   : > { %1928 = vmatprep.subr.mxu1 %v1995_v0  ;;  %1926 = vmatmul.mubr.msk.f32.vlgmr.msra.gmra.mxu1 %vm188_vm2, %v1851_v26 }
  0x92   : > { %v838_v29 = vpop.permute.xlu1 %837  ;;  %1842 = vmatmul.mubr.msk.f32.vlgmr.msra.gmra.mxu0 %vm188_vm2, %v173_v16  ;;  %v667_v30 = vpop.permute.xlu0 %666  ;;  %1930 = vmatprep.mubr.msk.f32.mxu1 %vm1996_vm0, %v1995_v0 }
  0x93   : > { %1847 = vmatpush1.msk.msra.mxu0 %vm192_vm1, %v504_v28  ;;  %579 = vmatprep.mubr.f32.mxu0 %v1995_v0  ;;  %v673_v32 = vsel %vm672_vm5, %v667_v30, %v669_v25  ;;  %vm1763_vm5 = vcmask 818176  }
  0x94   : > { %1852 = vmatprep.subr.msk.mxu0 %vm192_vm1, %v674_v31 }
  0x96   : > { %v836_v33 = vpop.permute.xlu1 %835  ;;  %1848 = vmatmul.mubr.msk.f32.vlgmr.msra.gmra.mxu0 %vm188_vm2, %v1845_v19  ;;  %v840_v34 = vpop.permute.xlu0 %839 }
  0x97   : > { %1853 = vmatpush1.msk.msra.mxu0 %vm192_vm1, %v673_v32  ;;  %v843_v36 = vsel %vm841_vm6, %v838_v29, %v840_v34  ;;  %1929 = vmatpush3.msk.msra.mxu1 %vm192_vm1, %v840_v34  ;;  %v842_v37 = vsel %vm841_vm6, %v836_v33, %v838_v29  ;;  %vm1732_vm6 = vcmask 1048448  }
  0x98   : > { %1858 = vmatprep.subr.msk.mxu0 %vm192_vm1, %v843_v36  ;;  %748 = vmatprep.mubr.f32.mxu0 %v1995_v0 }
  0x99   : > { %1933 = vmatprep.subr.mxu1 %v1995_v0  ;;  %1931 = vmatmul.mubr.msk.f32.vlgmr.msra.gmra.mxu1 %vm188_vm2, %v1857_v35 }
  0x9a   : > { %v1009_v38 = vpop.permute.xlu1 %1008  ;;  %1854 = vmatmul.mubr.msk.f32.vlgmr.msra.gmra.mxu0 %vm188_vm2, %v1851_v26  ;;  %v1007_v39 = vpop.permute.xlu0 %1006  ;;  %1935 = vmatprep.mubr.msk.f32.mxu1 %vm1996_vm0, %v1995_v0 }
  0x9b   : > { %1859 = vmatpush1.msk.msra.mxu0 %vm192_vm1, %v842_v37  ;;  %v1012_v41 = vsel %vm1010_vm7, %v1007_v39, %v1009_v38  ;;  %1934 = vmatpush3.msk.msra.mxu1 %vm192_vm1, %v1009_v38 }
  0x9c   : > { %1864 = vmatprep.subr.msk.mxu0 %vm192_vm1, %v1012_v41  ;;  %917 = vmatprep.mubr.f32.mxu0 %v1995_v0 }
  0x9d   : > { %1936 = vmatmul.mubr.msk.f32.vlgmr.msra.gmra.mxu1 %vm188_vm2, %v1863_v40  ;;  %1938 = vmatprep.subr.mxu1 %v1995_v0 }
  0x9e   : > { %v1176_v42 = vpop.permute.xlu1 %1175  ;;  %1860 = vmatmul.mubr.msk.f32.vlgmr.msra.gmra.mxu0 %vm188_vm2, %v1857_v35  ;;  %v1005_v43 = vpop.permute.xlu0 %1004  ;;  %1940 = vmatprep.mubr.msk.f32.mxu1 %vm1996_vm0, %v1995_v0 }
  0x9f   : > { %v1011_v44 = vsel %vm1010_vm7, %v1005_v43, %v1007_v39  ;;  %1086 = vmatprep.mubr.f32.mxu0 %v1995_v0  ;;  %vm1729_vm7 = vcmask 932864  }
  0xa0   : > { %1865 = vmatpush1.msk.msra.mxu0 %vm192_vm1, %v1011_v44 }
  0xa2   : > { %v1174_v46 = vpop.permute.xlu1 %1173  ;;  %1866 = vmatmul.mubr.msk.f32.vlgmr.msra.gmra.mxu0 %vm188_vm2, %v1863_v40  ;;  %v1178_v47 = vpop.permute.xlu0 %1177 }
  0xa3   : > { %v1180_v48 = vsel %vm1179_vm8, %v1174_v46, %v1176_v42  ;;  %v1181_v49 = vsel %vm1179_vm8, %v1176_v42, %v1178_v47  ;;  %1939 = vmatpush3.msk.msra.mxu1 %vm192_vm1, %v1178_v47  ;;  %1255 = vmatprep.mubr.f32.mxu0 %v1995_v0 }
  0xa4   : > { %1870 = vmatprep.subr.msk.mxu0 %vm192_vm1, %v1181_v49  ;;  %1941 = vmatmul.mubr.msk.f32.vlgmr.msra.gmra.mxu1 %vm188_vm2, %v1869_v45 }
  0xa5   : > { %1871 = vmatpush1.msk.msra.mxu0 %vm192_vm1, %v1180_v48  ;;  %1943 = vmatprep.subr.mxu1 %v1995_v0 }
  0xa6   : > { %v1347_v51 = vpop.permute.xlu1 %1346  ;;  %1872 = vmatmul.mubr.msk.f32.vlgmr.msra.gmra.mxu0 %vm188_vm2, %v1869_v45  ;;  %v1345_v52 = vpop.permute.xlu0 %1344  ;;  %1945 = vmatprep.mubr.msk.f32.mxu1 %vm1996_vm0, %v1995_v0 }
  0xa7   : > { %v1350_v53 = vsel %vm1348_vm9, %v1345_v52, %v1347_v51  ;;  %1944 = vmatpush3.msk.msra.mxu1 %vm192_vm1, %v1347_v51  ;;  %1424 = vmatprep.mubr.f32.mxu0 %v1995_v0 }
  0xa8   : > { %1876 = vmatprep.subr.msk.mxu0 %vm192_vm1, %v1350_v53  ;;  %1946 = vmatmul.mubr.msk.f32.vlgmr.msra.gmra.mxu1 %vm188_vm2, %v1875_v50 }
  0xa9   : > { %1948 = vmatprep.subr.mxu1 %v1995_v0  ;;  %1950 = vmatprep.mubr.msk.f32.mxu1 %vm1996_vm0, %v1995_v0  ;;  %vm1702_vm0 = vcmask 392448  }
  0xaa   : > { %v1514_v54 = vpop.permute.xlu1 %1513  ;;  %v1343_v55 = vpop.permute.xlu0 %1342 }
  0xab   : > { %v1349_v56 = vsel %vm1348_vm9, %v1343_v55, %v1345_v52 }
  0xac   : > { %1877 = vmatpush1.msk.msra.mxu0 %vm192_vm1, %v1349_v56 }
  0xad   : > { %1878 = vmatmul.mubr.msk.f32.vlgmr.msra.gmra.mxu0 %vm188_vm2, %v1875_v50 }
  0xae   : > { %v1512_v58 = vpop.permute.xlu1 %1511  ;;  %v1516_v59 = vpop.permute.xlu0 %1515  ;;  %1593 = vmatprep.mubr.f32.mxu0 %v1995_v0 }
  0xaf   : > { %v1518_v60 = vsel %vm1517_vm10, %v1512_v58, %v1514_v54  ;;  %v1519_v61 = vsel %vm1517_vm10, %v1514_v54, %v1516_v59  ;;  %1949 = vmatpush3.msk.msra.mxu1 %vm192_vm1, %v1516_v59 }
  0xb0   : > { %1882 = vmatprep.subr.msk.mxu0 %vm192_vm1, %v1519_v61  ;;  %1951 = vmatmul.mubr.msk.f32.vlgmr.msra.gmra.mxu1 %vm188_vm2, %v1881_v57 }
  0xb1   : > { %1883 = vmatpush1.msk.msra.mxu0 %vm192_vm1, %v1518_v60  ;;  %vm1707_vm1 = vcmask 523648  }
  0xb2   : > { %1884 = vmatmul.mubr.msk.f32.vlgmr.msra.gmra.mxu0 %vm188_vm2, %v1881_v57  ;;  %vm1712_vm2 = vcmask 654848  }
  0xbb   : > { %v1677_v49 = vpop.permute.xlu0 %1676 }
 0x144   : > { %v336_v62 = vpop.f32.mrf.mxu1 }
 0x146   : > { %v1912_v63 = vpop.f32.mrf.mxu1 }
 0x148   : > { %v486_v1 = vpop.f32.mrf.mxu1 }
 0x149   : > { %v487_v14 = vadd.f32 %v486_v1, %v336_v62 }
 0x14a   : > { %v1917_v2 = vpop.f32.mrf.mxu1 }
 0x14c   : > { %v652_v3 = vpop.f32.mrf.mxu1 }
 0x14d   : > { %v658_v19 = vadd.f32 %v652_v3, %v487_v14 }
 0x14e   : > { %v265_v4 = vpop.f32.mrf.mxu0  ;;  %v1922_v5 = vpop.f32.mrf.mxu1 }
 0x150   : > { %v267_v0 = vpop.f32.mrf.mxu0 }
 0x151   : > { %v821_v6 = vpop.f32.mrf.mxu1 }
 0x152   : > { %v415_v7 = vpop.f32.mrf.mxu0  ;;  %v827_v23 = vadd.f32 %v821_v6, %v658_v19 }
 0x153   : > { %v1927_v8 = vpop.f32.mrf.mxu1  ;;  %v416_v26 = vadd.f32 %v415_v7, %v265_v4 }
 0x154   : > { %v417_v9 = vpop.f32.mrf.mxu0 }
 0x155   : > { %v418_v28 = vadd.f32 %v417_v9, %v267_v0 }
 0x156   : > { %v581_v10 = vpop.f32.mrf.mxu0 }
 0x157   : > { %v656_v29 = vadd.f32 %v581_v10, %v416_v26 }
 0x158   : > { %v583_v11 = vpop.f32.mrf.mxu0 }
 0x159   : > { %v990_v12 = vpop.f32.mrf.mxu1  ;;  %v657_v33 = vadd.f32 %v583_v11, %v418_v28 }
 0x15a   : > { %v750_v13 = vpop.f32.mrf.mxu0  ;;  %v996_v30 = vadd.f32 %v990_v12, %v827_v23 }
 0x15b   : > { %v1932_v15 = vpop.f32.mrf.mxu1  ;;  %v825_v34 = vadd.f32 %v750_v13, %v656_v29 }
 0x15c   : > { %v752_v16 = vpop.f32.mrf.mxu0 }
 0x15d   : > { %v1159_v17 = vpop.f32.mrf.mxu1  ;;  %v826_v36 = vadd.f32 %v752_v16, %v657_v33 }
 0x15e   : > { %v919_v18 = vpop.f32.mrf.mxu0  ;;  %v1165_v38 = vadd.f32 %v1159_v17, %v996_v30 }
 0x15f   : > { %v1937_v20 = vpop.f32.mrf.mxu1  ;;  %v994_v37 = vadd.f32 %v919_v18, %v825_v34 }
 0x160   : > { %v921_v21 = vpop.f32.mrf.mxu0 }
 0x161   : > { %v995_v40 = vadd.f32 %v921_v21, %v826_v36 }
 0x162   : > { %v1088_v22 = vpop.f32.mrf.mxu0 }
 0x163   : > { %v1163_v41 = vadd.f32 %v1088_v22, %v994_v37 }
 0x164   : > { %v1090_v24 = vpop.f32.mrf.mxu0  ;;  %v1328_v25 = vpop.f32.mrf.mxu1 }
 0x165   : > { %v1334_v42 = vadd.f32 %v1328_v25, %v1165_v38  ;;  %v1164_v44 = vadd.f32 %v1090_v24, %v995_v40 }
 0x166   : > { %v1942_v27 = vpop.f32.mrf.mxu1  ;;  %v1257_v31 = vpop.f32.mrf.mxu0 }
 0x167   : > { %v1332_v45 = vadd.f32 %v1257_v31, %v1163_v41 }
 0x168   : > { %v1497_v32 = vpop.f32.mrf.mxu1  ;;  %v1259_v39 = vpop.f32.mrf.mxu0 }
 0x169   : > { %v1503_v46 = vadd.f32 %v1497_v32, %v1334_v42  ;;  %v1333_v50 = vadd.f32 %v1259_v39, %v1164_v44 }
 0x16a   : > { %v1947_v35 = vpop.f32.mrf.mxu1 }
 0x16d   : > { %v1426_v43 = vpop.f32.mrf.mxu0 }
 0x16e   : > { %v1501_v51 = vadd.f32 %v1426_v43, %v1332_v45 }
 0x16f   : > { %v1428_v47 = vpop.f32.mrf.mxu0 }
 0x170   : > { %v1666_v48 = vpop.f32.mrf.mxu1  ;;  %v1502_v55 = vadd.f32 %v1428_v47, %v1333_v50 }
 0x171   : > { %v1672_v52 = vadd.f32 %v1666_v48, %v1503_v46 }
 0x172   : > { %v1595_v53 = vpop.f32.mrf.mxu0  ;;  %v1952_v54 = vpop.f32.mrf.mxu1 }
 0x173   : > { %v1670_v56 = vadd.f32 %v1595_v53, %v1501_v51  ;;  %v1681_v57 = vadd.f32 %v1677_v49, %v1672_v52 }
 0x174   : > { %v1597_v58 = vpop.f32.mrf.mxu0 }
 0x175   : > { %v1679_v59 = vadd.f32 %v1677_v49, %v1670_v56  ;;  %v1671_v60 = vadd.f32 %v1597_v58, %v1502_v55  ;;  %vm1684_vm11 = vcmp.ge.f32.partialorder %v1681_v57, 0.0  ;;  %v1687_v61 = vmul.f32 0.1, %v1681_v57 }
 0x177   : > { %vm1682_vm13 = vcmp.ge.f32.partialorder %v1679_v59, 0.0  ;;  %v1685_v62 = vmul.f32 0.1, %v1679_v59  ;;  %v1680_v63 = vadd.f32 %v1677_v49, %v1671_v60  ;;  %v1690_v1 = vsel %vm1684_vm11, %v1681_v57, %v1687_v61 }
 0x178   : > { %1761 = vrot.lane.b32.xlu0 %v1690_v1, %s2006_s28 }
 0x179   : > { %v1688_v2 = vsel %vm1682_vm13, %v1679_v59, %v1685_v62  ;;  %v1686_v3 = vmul.f32 0.1, %v1680_v63  ;;  %vm1683_vm14 = vcmp.ge.f32.partialorder %v1680_v63, 0.0 }
 0x17a   : > { %1694 = vrot.lane.b32.xlu1 %v1688_v2, %s1998_s19  ;;  %1692 = vst.msk [vmem:[%s2217_s27] sm:$0xff] %vm1691_vm12, %v1688_v2  ;;  %s2012_s19 = smov 118  }
 0x17b   : > { %v1689_v4 = vsel %vm1683_vm14, %v1680_v63, %v1686_v3 }
 0x17c   : > { %1725 = vrot.lane.b32.xlu0 %v1688_v2, %s2007_s13 }
 0x17e   : > { %1699 = vrot.lane.b32.xlu1 %v1688_v2, %s2008_s29 }
 0x180   : > { %1738 = vrot.lane.b32.xlu0 %v1689_v4, %s1999_s20  ;;  %s2017_s20 = smov 98  }
 0x182   : > { %1704 = vrot.lane.b32.xlu1 %v1688_v2, %s2009_s30 }
 0x184   : > { %1742 = vrot.lane.b32.xlu0 %v1689_v4, %s2001_s22 }
 0x186   : > { %1709 = vrot.lane.b32.xlu1 %v1688_v2, %s2010_s4 }
 0x188   : > { %1746 = vrot.lane.b32.xlu0 %v1689_v4, %s2011_s5 }
 0x18a   : > { %1714 = vrot.lane.b32.xlu1 %v1688_v2, %s2012_s19 }
 0x18c   : > { %1750 = vrot.lane.b32.xlu0 %v1689_v4, %s2013_s6 }
 0x18e   : > { %1719 = vrot.lane.b32.xlu1 %v1688_v2, %s2014_s7 }
 0x190   : > { %1754 = vrot.lane.b32.xlu0 %v1689_v4, %s2015_s8 }
 0x192   : > { %1734 = vrot.lane.b32.xlu1 %v1689_v4, %s2016_s9 }
 0x194   : > { %1767 = vrot.lane.b32.xlu0 %v1690_v1, %s2017_s20 }
 0x196   : > { %1759 = vrot.lane.b32.xlu1 %v1689_v4, %s2006_s28 }
 0x19a   : > { %1727 = vrot.lane.b32.xlu1 %v1689_v4, %s2007_s13 }
 0x1ea   : > { %v1762_v5 = vpop.permute.xlu0 %1761 }
 0x1ec   : > { %v1695_v0 = vpop.permute.xlu1 %1694 }
 0x1ed   : > { %1698 = vst.msk [vmem:[%s2217_s27] sm:$0xff] %vm1697_vm15, %v1695_v0 }
 0x1ee   : > { %v1726_v6 = vpop.permute.xlu0 %1725 }
 0x1f0   : > { %v1700_v7 = vpop.permute.xlu1 %1699 }
 0x1f1   : > { %1703 = vst.msk [vmem:[%s2217_s27] sm:$0xff] %vm1702_vm0, %v1700_v7 }
 0x1f2   : > { %v1739_v8 = vpop.permute.xlu0 %1738 }
 0x1f4   : > { %v1705_v9 = vpop.permute.xlu1 %1704 }
 0x1f5   : > { %1708 = vst.msk [vmem:[%s2217_s27] sm:$0xff] %vm1707_vm1, %v1705_v9 }
 0x1f6   : > { %v1743_v10 = vpop.permute.xlu0 %1742 }
 0x1f8   : > { %v1710_v11 = vpop.permute.xlu1 %1709 }
 0x1f9   : > { %1713 = vst.msk [vmem:[%s2217_s27] sm:$0xff] %vm1712_vm2, %v1710_v11 }
 0x1fa   : > { %v1747_v12 = vpop.permute.xlu0 %1746 }
 0x1fc   : > { %v1715_v13 = vpop.permute.xlu1 %1714 }
 0x1fd   : > { %1718 = vst.msk [vmem:[%s2217_s27] sm:$0xff] %vm1717_vm3, %v1715_v13 }
 0x1fe   : > { %v1751_v14 = vpop.permute.xlu0 %1750 }
 0x200   : > { %v1720_v15 = vpop.permute.xlu1 %1719 }
 0x201   : > { %1723 = vst.msk [vmem:[%s2217_s27] sm:$0xff] %vm1722_vm4, %v1720_v15 }
 0x202   : > { %v1755_v17 = vpop.permute.xlu0 %1754 }
 0x204   : > { %v1735_v16 = vpop.permute.xlu1 %1734 }
 0x205   : > { %1737 = vst.msk [vmem:[%s2217_s27 + $0x8] sm:$0xff] %vm1691_vm12, %v1735_v16 }
 0x206   : > { %1741 = vst.msk [vmem:[%s2217_s27 + $0x8] sm:$0xff] %vm1697_vm15, %v1739_v8  ;;  %v1768_v20 = vpop.permute.xlu0 %1767 }
 0x207   : > { %1745 = vst.msk [vmem:[%s2217_s27 + $0x8] sm:$0xff] %vm1702_vm0, %v1743_v10 }
 0x208   : > { %1749 = vst.msk [vmem:[%s2217_s27 + $0x8] sm:$0xff] %vm1707_vm1, %v1747_v12  ;;  %v1760_v18 = vpop.permute.xlu1 %1759 }
 0x209   : > { %1753 = vst.msk [vmem:[%s2217_s27 + $0x8] sm:$0xff] %vm1712_vm2, %v1751_v14  ;;  %v1764_v19 = vsel %vm1763_vm5, %v1760_v18, %v1762_v5 }
 0x20a   : > { %1757 = vst.msk [vmem:[%s2217_s27 + $0x8] sm:$0xff] %vm1717_vm3, %v1755_v17 }
 0x20b   : > { %1766 = vst.msk [vmem:[%s2217_s27 + $0x8] sm:$0xff] %vm1722_vm4, %v1764_v19 }
 0x20c   : > { %1770 = vst.msk [vmem:[%s2217_s27 + $0x8] sm:$0xff] %vm1732_vm6, %v1768_v20  ;;  %v1728_v21 = vpop.permute.xlu1 %1727 }
 0x20d   : > { %v1730_v22 = vsel %vm1729_vm7, %v1726_v6, %v1728_v21 }
 0x20e   : > { %1733 = vst.msk [vmem:[%s2217_s27] sm:$0xff] %vm1732_vm6, %v1730_v22 }
 0x20f PF: > { %s13_s12 = sadd.s32 1, %s1993_s12  }
 0x210   : > { %p10_p4 = scmp.ge.s32.totalorder %s13_s12, 4  }
 0x212   :  { %12 = sbr.rel (!%p10_p4) target bundleno = 1 (0x1), region = 70 }

</bundles_post_ra>
